<compile_context>
chip_gen: v7x
topology: tpu7x:2x2x1
jax: 0.10.0
libtpu: 0.0.40
codegen_flags: <defaults>
</compile_context>

<pallas_src>
import math

import numpy as np
import jax
import jax.numpy as jnp
from jax.experimental import pallas as pl
from jax.experimental.pallas import tpu as pltpu


def d_out(dimensionality: int, num_octaves: int) -> int:
    return dimensionality * 2 * num_octaves


def _cdiv(a: int, b: int) -> int:
    return -(-a // b)


def _pos_enc_kernel(x_ref, w_ref, freq_ref, off_ref, o_ref):
    """One grid step: encode `tn` packed rows.

    x_ref    : (tn, L_in_pad)    f32  packed input rows
    w_ref    : (L_in_pad, L_out) f32  0/1 lane-gather matrix (baked, passed in)
    freq_ref : (1, L_out)        f32  per-output-lane frequency 2*pi*2^k
    off_ref  : (1, L_out)        f32  0 on sin lanes, pi/2 on cos lanes
    o_ref    : (tn, L_out)            encoded rows
    """
    x = x_ref[...]

    # Exact 3-way split of x into bf16-representable pieces (x == hi+mid+lo).
    # Each piece survives any f32->bf16 rounding inside the MXU, so the gather
    # matmuls below are exact in f32 irrespective of matmul precision mode.
    hi = x.astype(jnp.bfloat16).astype(jnp.float32)
    r = x - hi
    mid = r.astype(jnp.bfloat16).astype(jnp.float32)
    lo = r - mid

    w = w_ref[...]
    gathered = (jnp.dot(hi, w, preferred_element_type=jnp.float32)
                + jnp.dot(mid, w, preferred_element_type=jnp.float32)
                + jnp.dot(lo, w, preferred_element_type=jnp.float32))

    # phase = x[src_lane] * (2*pi*2^k), plus pi/2 on cos lanes -> single sin.
    phases = gathered * freq_ref[...] + off_ref[...]
    o_ref[...] = jnp.sin(phases).astype(o_ref.dtype)


def positional_encoding(samples, num_octaves, *, tile_packed_rows=2048,
                        out_dtype=jnp.float32):
    """Apply NeRF positional encoding to the last axis of `samples`.

    samples: (*batch, dim) float array
    returns: (*batch, dim * 2 * num_octaves) in `out_dtype` (f32 default;
             bf16 halves the dominant HBM store traffic — biggest win on v5e).
    """
    samples = jnp.asarray(samples, jnp.float32)
    *batch, dim = samples.shape
    d = d_out(dim, num_octaves)
    n = math.prod(batch) if batch else 1
    x2d = samples.reshape(n, dim)

    # ---- pack consecutive logical rows so the output lane width is a
    #      multiple of 128 (dense, unmasked 128-lane stores) -----------------
    pack = 128 // math.gcd(d, 128)
    L_in = pack * dim
    L_out = pack * d
    L_in_pad = max(8, _cdiv(L_in, 8) * 8)

    out_itemsize = np.dtype(out_dtype).itemsize
    row_mult = 8 if out_itemsize >= 4 else 32 // out_itemsize  # sublane packing

    # ---- packed-row tile size ---------------------------------------------
    # 8 MiB output-tile cap: double-buffered in+out (+ tiny tables) stays well
    # under 32 MiB scoped VMEM even on v7x, while amortising per-step overhead.
    max_tile_bytes = 8 * 1024 * 1024
    tn_cap = max(row_mult,
                 (max_tile_bytes // (L_out * out_itemsize)) // row_mult * row_mult)
    n_p = _cdiv(n, pack)
    tn = min(tile_packed_rows, tn_cap)
    steps = max(1, _cdiv(n_p, tn))
    if steps == 1 and n_p > row_mult:
        steps = 2  # >=2 grid steps so v7x's two TensorCores both get work
    tn = min(tn_cap, _cdiv(_cdiv(n_p, steps), row_mult) * row_mult)
    steps = _cdiv(n_p, tn)
    n_p_pad = steps * tn
    n_pad = n_p_pad * pack

    if n_pad != n:
        x2d = jnp.pad(x2d, ((0, n_pad - n), (0, 0)))
    x_packed = x2d.reshape(n_p_pad, L_in)              # free row-major reshape
    if L_in_pad != L_in:
        x_packed = jnp.pad(x_packed, ((0, 0), (0, L_in_pad - L_in)))

    # ---- baked lane tables (passed as kernel INPUTS, not captured consts) --
    lanes = np.arange(L_out)
    p_idx = lanes // d                                  # packed logical row
    rem = lanes % d
    c_idx = rem // (2 * num_octaves)                    # channel
    k_idx = (rem % num_octaves).astype(np.float32)      # octave
    is_sin = (rem % (2 * num_octaves)) < num_octaves
    src_lane = p_idx * dim + c_idx                      # input lane per out lane

    w_np = np.zeros((L_in_pad, L_out), np.float32)
    w_np[src_lane, lanes] = 1.0
    freq_np = (np.float32(2.0 * np.pi) * np.exp2(k_idx)).astype(np.float32)[None, :]
    off_np = np.where(is_sin, np.float32(0.0),
                      np.float32(0.5 * np.pi)).astype(np.float32)[None, :]

    out_packed = pl.pallas_call(
        _pos_enc_kernel,
        out_shape=jax.ShapeDtypeStruct((n_p_pad, L_out), out_dtype),
        grid_spec=pl.GridSpec(
            grid=(steps,),
            in_specs=[
                pl.BlockSpec((tn, L_in_pad), lambda i: (i, 0)),
                pl.BlockSpec((L_in_pad, L_out), lambda i: (0, 0)),
                pl.BlockSpec((1, L_out), lambda i: (0, 0)),
                pl.BlockSpec((1, L_out), lambda i: (0, 0)),
            ],
            out_specs=pl.BlockSpec((tn, L_out), lambda i: (i, 0)),
        ),
        compiler_params=pltpu.CompilerParams(
            dimension_semantics=("parallel",),
            vmem_limit_bytes=32 * 1024 * 1024,
        ),
    )(x_packed, jnp.asarray(w_np), jnp.asarray(freq_np), jnp.asarray(off_np))

    out2d = out_packed.reshape(n_pad, d)                # free row-major reshape
    if n_pad != n:
        out2d = out2d[:n]
    return out2d.reshape(*batch, d)


def _reference(samples, num_octaves):
    """Pure-JAX reference mirroring the PyTorch module semantics."""
    samples = samples.astype(jnp.float32)
    freqs = 2.0 * jnp.pi * (2.0 ** jnp.arange(num_octaves, dtype=jnp.float32))
    phases = samples[..., None] * freqs                 # (*batch, dim, O)
    enc = jnp.concatenate([jnp.sin(phases), jnp.cos(phases)], axis=-1)
    return enc.reshape(*samples.shape[:-1], -1)


if __name__ == "__main__":
    num_octaves = 8

    # (*batch, dim) = (2, 16, 3): e.g. 2 scenes x 16 samples of 3-D coordinates.
    x = jax.random.uniform(jax.random.PRNGKey(0), (2, 16, 3), dtype=jnp.float32)
    out = jax.block_until_ready(positional_encoding(x, num_octaves))
    ref = _reference(x, num_octaves)
    assert out.shape == (2, 16, d_out(3, num_octaves)), out.shape
    # Sin lanes are bitwise-identical to the reference (exact MXU gather + same
    # f32 multiply). Cos lanes use sin(phase + pi/2); at the top octave the
    # phase is ~8e2 where one f32 ulp is ~6e-5, so allow a slightly loosened
    # tolerance for that rounding.
    assert jnp.allclose(out, ref, atol=2e-4, rtol=2e-4), "mismatch vs reference"

    # Second case exercising row padding and a non-power-of-two batch.
    x2 = jax.random.uniform(jax.random.PRNGKey(1), (3, 500, 3), dtype=jnp.float32)
    out2 = jax.block_until_ready(positional_encoding(x2, num_octaves))
    ref2 = _reference(x2, num_octaves)
    assert out2.shape == ref2.shape, out2.shape
    assert jnp.allclose(out2, ref2, atol=2e-4, rtol=2e-4), "mismatch vs reference (2)"

    print("KERNEL_OK")
</pallas_src>

<mosaic_0001>
module attributes {stable_mosaic.version = 11 : i64} {
  func.func @_pos_enc_kernel(%arg0: i32, %arg1: memref<8x24xf32, #tpu.memory_space<vmem>>, %arg2: memref<24x384xf32, #tpu.memory_space<vmem>>, %arg3: memref<1x384xf32, #tpu.memory_space<vmem>>, %arg4: memref<1x384xf32, #tpu.memory_space<vmem>>, %arg5: memref<8x384xf32, #tpu.memory_space<vmem>>) attributes {dimension_semantics = [#tpu.dimension_semantics<parallel>], iteration_bounds = array<i64: 1>, scalar_prefetch = 0 : i64, scratch_operands = 0 : i64, tpu.core_type = #tpu.core_type<tc>, window_params = [{transform_indices = @transform_0, window_bounds = array<i64: 8, 24>}, {pipeline_mode = #tpu.pipeline_mode<synchronous>, transform_indices = @transform_1, window_bounds = array<i64: 24, 384>}, {pipeline_mode = #tpu.pipeline_mode<synchronous>, transform_indices = @transform_2, window_bounds = array<i64: 1, 384>}, {pipeline_mode = #tpu.pipeline_mode<synchronous>, transform_indices = @transform_3, window_bounds = array<i64: 1, 384>}, {transform_indices = @transform_4, window_bounds = array<i64: 8, 384>}]} {
    %c0 = arith.constant 0 : index
    %c0_0 = arith.constant 0 : index
    %0 = vector.load %arg1[%c0, %c0_0] : memref<8x24xf32, #tpu.memory_space<vmem>>, vector<8x24xf32>
    %1 = arith.truncf %0 : vector<8x24xf32> to vector<8x24xbf16>
    %2 = arith.extf %1 : vector<8x24xbf16> to vector<8x24xf32>
    %3 = arith.subf %0, %2 : vector<8x24xf32>
    %4 = arith.truncf %3 : vector<8x24xf32> to vector<8x24xbf16>
    %5 = arith.extf %4 : vector<8x24xbf16> to vector<8x24xf32>
    %6 = arith.subf %3, %5 : vector<8x24xf32>
    %c0_1 = arith.constant 0 : index
    %c0_2 = arith.constant 0 : index
    %7 = vector.load %arg2[%c0_1, %c0_2] : memref<24x384xf32, #tpu.memory_space<vmem>>, vector<24x384xf32>
    %cst = arith.constant dense<0.000000e+00> : vector<8x384xf32>
    %8 = tpu.matmul %2, %7, %cst {dimension_numbers = #tpu.dot_dimension_numbers<[1], [0], [0], [1], [0, 0, 1, 1], [], []>} : vector<8x24xf32>, vector<24x384xf32>, vector<8x384xf32> -> vector<8x384xf32>
    %cst_3 = arith.constant dense<0.000000e+00> : vector<8x384xf32>
    %9 = tpu.matmul %5, %7, %cst_3 {dimension_numbers = #tpu.dot_dimension_numbers<[1], [0], [0], [1], [0, 0, 1, 1], [], []>} : vector<8x24xf32>, vector<24x384xf32>, vector<8x384xf32> -> vector<8x384xf32>
    %10 = arith.addf %8, %9 : vector<8x384xf32>
    %cst_4 = arith.constant dense<0.000000e+00> : vector<8x384xf32>
    %11 = tpu.matmul %6, %7, %cst_4 {dimension_numbers = #tpu.dot_dimension_numbers<[1], [0], [0], [1], [0, 0, 1, 1], [], []>} : vector<8x24xf32>, vector<24x384xf32>, vector<8x384xf32> -> vector<8x384xf32>
    %12 = arith.addf %10, %11 : vector<8x384xf32>
    %c0_5 = arith.constant 0 : index
    %c0_6 = arith.constant 0 : index
    %13 = vector.load %arg3[%c0_5, %c0_6] : memref<1x384xf32, #tpu.memory_space<vmem>>, vector<1x384xf32>
    %14 = vector.broadcast %13 : vector<1x384xf32> to vector<8x384xf32>
    %15 = arith.mulf %12, %14 : vector<8x384xf32>
    %c0_7 = arith.constant 0 : index
    %c0_8 = arith.constant 0 : index
    %16 = vector.load %arg4[%c0_7, %c0_8] : memref<1x384xf32, #tpu.memory_space<vmem>>, vector<1x384xf32>
    %17 = vector.broadcast %16 : vector<1x384xf32> to vector<8x384xf32>
    %18 = arith.addf %15, %17 : vector<8x384xf32>
    %19 = math.sin %18 : vector<8x384xf32>
    %c0_9 = arith.constant 0 : index
    %c0_10 = arith.constant 0 : index
    %20 = vector.load %arg5[%c0_9, %c0_10] : memref<8x384xf32, #tpu.memory_space<vmem>>, vector<8x384xf32>
    tpu.vector_store %arg5[%c0_9, %c0_10], %19 {strides = array<i32>} : memref<8x384xf32, #tpu.memory_space<vmem>>, vector<8x384xf32>,
    return
  }
  func.func @transform_0(%arg0: i32) -> (i32, i32) {
    %c0_i32 = arith.constant 0 : i32
    %c0_i32_0 = arith.constant 0 : i32
    return %arg0, %c0_i32 : i32, i32
  }
  func.func @transform_1(%arg0: i32) -> (i32, i32) {
    %c0_i32 = arith.constant 0 : i32
    %c0_i32_0 = arith.constant 0 : i32
    %c0_i32_1 = arith.constant 0 : i32
    return %c0_i32, %c0_i32_0 : i32, i32
  }
  func.func @transform_2(%arg0: i32) -> (i32, i32) {
    %c0_i32 = arith.constant 0 : i32
    %c0_i32_0 = arith.constant 0 : i32
    %c0_i32_1 = arith.constant 0 : i32
    return %c0_i32, %c0_i32_0 : i32, i32
  }
  func.func @transform_3(%arg0: i32) -> (i32, i32) {
    %c0_i32 = arith.constant 0 : i32
    %c0_i32_0 = arith.constant 0 : i32
    %c0_i32_1 = arith.constant 0 : i32
    return %c0_i32, %c0_i32_0 : i32, i32
  }
  func.func @transform_4(%arg0: i32) -> (i32, i32) {
    %c0_i32 = arith.constant 0 : i32
    %c0_i32_0 = arith.constant 0 : i32
    return %arg0, %c0_i32 : i32, i32
  }
}

</mosaic_0001>

<bundles_post_ra>
// kernel: tpu_custom_call.1
= control target key start
LH: loop header
LB: loop body
LE: loop exit
PB: predicated region body
PF: predicated region fallthrough
CT: control target
= control target key end

     0   :  { %9 = vsyncpa [#allocation3], 0  ;;  %s1373_s0 = inlined_call_operand.hbm [shape: f32[8,24], index: 0, kind: input, shape index: {}]   ;;  %s1374_s1 = inlined_call_operand.hbm [shape: f32[24,384], index: 1, kind: input, shape index: {}]   ;;  %s1375_s2 = inlined_call_operand.vmem [shape: f32[1,384], index: 2, kind: input, shape index: {}]   ;;  %s1376_s3 = inlined_call_operand.vmem [shape: f32[1,384], index: 3, kind: input, shape index: {}]   ;;  %s1377_s4 = inlined_call_operand.hbm [shape: f32[8,384], index: 4, kind: output, shape index: {}]  }
   0x1   :  { %10 = vsyncpa [#allocation6], 0 }
   0x2   :  { %11 = vsyncpa [#allocation4], 0  ;;  %s1063_s15 = smov [#allocation2]   ;;  %s1064_s17 = smov [#allocation5]  }
   0x3   :  { %s18_s16 = sshll.u32 %s1063_s15, 4  ;;  %s27_s18 = sshll.u32 %s1064_s17, 4  ;;  %s19_s16 = int_to_ptr.vmem [resolvable:$true] %s18_s16  ;;  %s1102_s18 = int_to_ptr.vmem [resolvable:$true] %s27_s18 }
   0x4   :  { %s991_s21 = scalar_lea.hbm %s1373_s0, 128 }
   0x5   :  { %p992_p0 = scmp.ne.s32.totalorder %s1373_s0, %s991_s21  ;;  %p995_p1 = scmp.lt.u32.totalorder %s991_s21, %s1373_s0 }
   0x7   :  { %p997_p2 = pnand %p995_p1, %p992_p0 }
   0x9   :  { %1000 = shalt.err (!%p997_p2)
}
   0xa   :  { %s1001_s26 = scalar_lea.vmem %s19_s16, 128  ;;  %p1006_p4 = scmp.lt.s32.totalorder %s19_s16, %s19_s16 }
   0xb   :  { %p1002_p3 = scmp.ne.s32.totalorder %s19_s16, %s1001_s26  ;;  %p1007_p5 = scmp.lt.s32.totalorder %s1001_s26, %s1001_s26 }
   0xd   :  { %p1008_p6 = por %p1007_p5, %p1006_p4 }
   0xf   :  { %p1009_p7 = pnand %p1008_p6, %p1002_p3 }
  0x11   :  { %1012 = shalt.err (!%p1009_p7)
}
  0x12   :  { %21 = dma.hbm_to_vmem [thread:$0]  %s1373_s0, 128, %s19_s16, [#allocation3]  }
  0x13   :  { %s1013_s5 = scalar_lea.hbm %s1374_s1, 1152 }
  0x14   :  { %p1014_p8 = scmp.ne.s32.totalorder %s1374_s1, %s1013_s5  ;;  %p1017_p9 = scmp.lt.u32.totalorder %s1013_s5, %s1374_s1 }
  0x16   :  { %p1019_p10 = pnand %p1017_p9, %p1014_p8 }
  0x18   :  { %1022 = shalt.err (!%p1019_p10)
}
  0x19   :  { %s1023_s10 = scalar_lea.vmem %s1102_s18, 1152  ;;  %p1028_p12 = scmp.lt.s32.totalorder %s1102_s18, %s1102_s18 }
  0x1a   :  { %p1024_p11 = scmp.ne.s32.totalorder %s1102_s18, %s1023_s10  ;;  %p1029_p13 = scmp.lt.s32.totalorder %s1023_s10, %s1023_s10 }
  0x1c   :  { %p1030_p0 = por %p1029_p13, %p1028_p12 }
  0x1e   :  { %p1031_p1 = pnand %p1030_p0, %p1024_p11 }
  0x20   :  { %1034 = shalt.err (!%p1031_p1)
}
  0x21   :  { %s1065_s0 = smov 384   ;;  %s1066_s11 = smov 24  }
  0x22   :  { %33 = dma.hbm_to_vmem [thread:$0]  %s1374_s1, 1152, %s1102_s18, [#allocation6], %s1065_s0, %s1065_s0, %s1066_s11  }
  0x23   :  { %1057 = dma.done.wait [#allocation3], 128  }
  0x24   :  { %1058 = vsyncadd [#allocation3], 4294967168 }
  0x25   :  { %1059 = dma.done.wait [#allocation6], 1152  }
  0x26   :  { %1060 = vsyncadd [#allocation6], 4294966144  ;;  %v1067_v0 = vmov 0.0|0.0   ;;  %v1068_v1 = vmov 0.0   ;;  %vm1069_vm0 = vmmov 0   ;;  %v52_v2 = vld [vmem:[#allocation5 + $0x8] sm:$0xff]  ;;  %v498_v21 = vlaneseq }
  0x27   :  { %928 = vmatprep.subr.bf16.mxu1 %v1067_v0  ;;  %128 = vmatprep.mubr.f32.mxu0 %v1068_v1  ;;  %v55_v3 = vld [vmem:[#allocation5 + $0x20] sm:$0xff]  ;;  %v54_v6 = vld [vmem:[#allocation5 + $0x18] sm:$0xff]  ;;  %v53_v7 = vld [vmem:[#allocation5 + $0x10] sm:$0xff]  ;;  %vm60_vm1 = vcmask 195584  }
  0x28   :  { %903 = vmatprep.mubr.msk.f32.mxu1 %vm1069_vm0, %v1068_v1  ;;  %v51_v4 = vld [vmem:[#allocation5] sm:$0xff]  ;;  %v924_v5 = vpack.c.bf16 %v55_v3, %v52_v2  ;;  %v56_v8 = vld [vmem:[#allocation5 + $0x28] sm:$0xff]  ;;  %v58_v11 = vld [vmem:[#allocation5 + $0x38] sm:$0xff]  ;;  %v499_v22 = vshrl.u32 %v498_v21, 7 }
  0x29   :  { %v926_v9 = vpack.c.bf16 %v54_v6, %v51_v4  ;;  %v929_v10 = vpack.c.bf16 %v56_v8, %v53_v7  ;;  %v44_v12 = vld [vmem:[#allocation2] sm:$0xff]  ;;  %v57_v14 = vld [vmem:[#allocation5 + $0x30] sm:$0xff]  ;;  %v59_v15 = vld [vmem:[#allocation5 + $0x40] sm:$0xff] }
  0x2a   :  { %925 = vmatprep.subr.bf16.mxu0 %v924_v5  ;;  %v45_v13 = vpack.c.bf16 %v44_v12, %v44_v12  ;;  %v500_v23 = vsub.s32 0, %v499_v22  ;;  %v508_v24 = vsub.s32 2, %v499_v22  ;;  %v496_v25 = vld [vmem:[%s1375_s2] sm:$0x7]  ;;  %v504_v26 = vsub.s32 1, %v499_v22  ;;  %s1076_s2 = smov [#allocation7]  }
  0x2b   :  { %927 = vmatpush1.bf16.msra.mxu0 %v926_v9  ;;  %930 = vmatpush3.bf16.msra.mxu1 %v929_v10  ;;  %v516_v27 = vld [vmem:[%s1376_s3] sm:$0x7]  ;;  %s857_s3 = sshll.u32 %s1076_s2, 4  ;;  %s858_s3 = int_to_ptr.vmem [resolvable:$true] %s857_s3 }
  0x2c   :  { %68 = vmatprep.subr.mxu0 %v58_v11  ;;  %901 = vmatprep.subr.mxu1 %v1068_v1  ;;  %v46_v16 = vunpack.c.l.bf16 %v45_v13  ;;  %v501_v28 = vrot.slane %v496_v25, %v500_v23  ;;  %v509_v29 = vrot.slane %v496_v25, %v508_v24  ;;  %v505_v30 = vrot.slane %v496_v25, %v504_v26  ;;  %s1035_s17 = scalar_lea.vmem %s858_s3, 384  ;;  %p1040_p3 = scmp.lt.s32.totalorder %s858_s3, %s858_s3 }
  0x2d   :  { %v521_v31 = vrot.slane %v516_v27, %v500_v23  ;;  %v529_v32 = vrot.slane %v516_v27, %v508_v24  ;;  %v525_v35 = vrot.slane %v516_v27, %v504_v26  ;;  %v1075_v26 = vmov 1326507024   ;;  %p1036_p2 = scmp.ne.s32.totalorder %s858_s3, %s1035_s17  ;;  %p1041_p4 = scmp.lt.s32.totalorder %s1035_s17, %s1035_s17 }
  0x2e   :  { %v47_v17 = vsub.f32 %v44_v12, %v46_v16  ;;  %v1071_v12 = vmov 2475754826  }
  0x2f   :  { %69 = vmatpush1.msra.mxu0 %v57_v14  ;;  %902 = vmatpush3.msra.mxu1 %v59_v15  ;;  %p1042_p5 = por %p1041_p4, %p1040_p3 }
  0x30   :  { %932 = vmatprep.subr.bf16.mxu0 %v924_v5  ;;  %935 = vmatprep.subr.bf16.mxu1 %v1067_v0  ;;  %v48_v18 = vpack.c.bf16 %v47_v17, %v47_v17 }
  0x31   :  { %p1043_p6 = pnand %p1042_p5, %p1036_p2 }
  0x32   :  { %v49_v19 = vunpack.c.l.bf16 %v48_v18 }
  0x34   :  { %867 = vmatmul.mubr.msk.f32.vlgmr.msra.gmra.mrb[0].mxu0 %vm60_vm1, %v49_v19  ;;  %904 = vmatmul.mubr.msk.f32.vlgmr.msra.gmra.mrb[0].mxu1 %vm60_vm1, %v49_v19  ;;  %v50_v20 = vsub.f32 %v47_v17, %v49_v19  ;;  %v1073_v17 = vmov 2102212464   ;;  %v1074_v19 = vmov 920167782  }
  0x35   :  { %934 = vmatpush1.bf16.msra.mxu0 %v926_v9  ;;  %937 = vmatpush3.bf16.msra.mxu1 %v929_v10 }
  0x36   :  { %212 = vmatprep.subr.mxu0 %v58_v11  ;;  %910 = vmatprep.subr.mxu1 %v1068_v1 }
  0x37   :  { %272 = vmatprep.mubr.f32.mxu0 %v1068_v1  ;;  %912 = vmatprep.mubr.msk.f32.mxu1 %vm1069_vm0, %v1068_v1 }
  0x39   :  { %213 = vmatpush1.msra.mxu0 %v57_v14  ;;  %911 = vmatpush3.msra.mxu1 %v59_v15 }
  0x3a   :  { %939 = vmatprep.subr.bf16.mxu0 %v924_v5  ;;  %942 = vmatprep.subr.bf16.mxu1 %v1067_v0 }
  0x3c   :  { %869 = vmatmul.mubr.msk.f32.vlgmr.msra.gmra.mrb[0].mxu0 %vm60_vm1, %v46_v16  ;;  %913 = vmatmul.mubr.msk.f32.vlgmr.msra.gmra.mrb[0].mxu1 %vm60_vm1, %v46_v16 }
  0x3d   :  { %941 = vmatpush1.bf16.msra.mxu0 %v926_v9  ;;  %944 = vmatpush3.bf16.msra.mxu1 %v929_v10  ;;  %v1070_v10 = vmov 683565275  }
  0x3e   :  { %356 = vmatprep.subr.mxu0 %v58_v11  ;;  %919 = vmatprep.subr.mxu1 %v1068_v1 }
  0x3f   :  { %416 = vmatprep.mubr.f32.mxu0 %v1068_v1  ;;  %921 = vmatprep.mubr.msk.f32.mxu1 %vm1069_vm0, %v1068_v1 }
  0x41   :  { %357 = vmatpush1.msra.mxu0 %v57_v14  ;;  %920 = vmatpush3.msra.mxu1 %v59_v15  ;;  %v1072_v15 = vmov 2131351028  }
  0x44   :  { %871 = vmatmul.mubr.msk.f32.vlgmr.msra.gmra.mrb[0].mxu0 %vm60_vm1, %v50_v20  ;;  %922 = vmatmul.mubr.msk.f32.vlgmr.msra.gmra.mrb[0].mxu1 %vm60_vm1, %v50_v20 }
 0x117   :  { %v418_v33 = vpop.f32.mrb[0].mxu0  ;;  %v489_v34 = vpop.f32.mrb[0].mxu1 }
 0x118   :  { %v513_v36 = vmul.f32 %v501_v28, %v418_v33  ;;  %v515_v37 = vmul.f32 %v509_v29, %v489_v34  ;;  %v420_v38 = vpop.f32.mrb[1].mxu0  ;;  %v923_v39 = vpop.f32.mrb[1].mxu1 }
 0x119   :  { %v514_v40 = vmul.f32 %v505_v30, %v420_v38 }
 0x11a   :  { %v1148_v41 = vadd.f32 %v521_v31, %v513_v36  ;;  %v1150_v42 = vadd.f32 %v529_v32, %v515_v37 }
 0x11b   :  { %v1152_v43 = vadd.f32 %v525_v35, %v514_v40 }
 0x11c   :  { %v536_v44 = vand.u32 2147483647, %v1148_v41  ;;  %v539_v45 = vand.u32 2139095040, %v1148_v41  ;;  %v744_v46 = vand.u32 2147483647, %v1150_v42  ;;  %v747_v47 = vand.u32 2139095040, %v1150_v42 }
 0x11d   :  { %v643_v50 = vand.u32 2139095040, %v1152_v43  ;;  %v640_v53 = vand.u32 2147483647, %v1152_v43 }
 0x11e   :  { %v540_v48 = vshrl.u32 %v539_v45, 23  ;;  %v543_v49 = vand.u32 8388607, %v536_v44  ;;  %v748_v51 = vshrl.u32 %v747_v47, 23  ;;  %v751_v52 = vand.u32 8388607, %v744_v46 }
 0x11f   :  { %v644_v55 = vshrl.u32 %v643_v50, 23  ;;  %v1166_v62 = vand.u32 8388607, %v640_v53 }
 0x120   :  { %v873_v54 = vadd.s32 4294967169, %v540_v48  ;;  %v544_v56 = vor.u32 8388608, %v543_v49  ;;  %v881_v57 = vadd.s32 4294967169, %v748_v51  ;;  %v752_v60 = vor.u32 8388608, %v751_v52 }
 0x121   :  { %v877_v59 = vadd.s32 4294967169, %v644_v55  ;;  %v648_v8 = vor.u32 8388608, %v1166_v62 }
 0x122   :  { %v546_v58 = vadd.s32 1, %v873_v54  ;;  %v754_v61 = vadd.s32 1, %v881_v57  ;;  %v1168_v1 = vshll.u32 %v544_v56, 8  ;;  %v1172_v7 = vshll.u32 %v752_v60, 8 }
 0x123   :  { %v650_v63 = vadd.s32 1, %v877_v59 }
 0x124   :  { %vm547_vm2 = vcmp.gt.s32.totalorder %v546_v58, 0  ;;  %vm755_vm3 = vcmp.gt.s32.totalorder %v754_v61, 0 }
 0x125   :  { %v548_v0 = vsel %vm547_vm2, %v546_v58, 0  ;;  %v756_v4 = vsel %vm755_vm3, %v754_v61, 0  ;;  %vm651_vm4 = vcmp.gt.s32.totalorder %v650_v63, 0 }
 0x126   :  { %v549_v2 = vshrl.u32 %v548_v0, 5  ;;  %v550_v3 = vand.u32 31, %v548_v0  ;;  %v1170_v5 = vshrl.u32 %v756_v4, 5  ;;  %v758_v6 = vand.u32 31, %v756_v4 }
 0x127   :  { %v1177_v14 = vsel %vm651_vm4, %v650_v63, 0 }
 0x128   :  { %v551_v9 = vsub.s32 32, %v550_v3  ;;  %v553_v11 = vshll.u32 %v1070_v10, %v550_v3  ;;  %v556_v13 = vshll.u32 %v1071_v12, %v550_v3  ;;  %v559_v16 = vshll.u32 %v1072_v15, %v550_v3 }
 0x129   :  { %v562_v18 = vshll.u32 %v1073_v17, %v550_v3  ;;  %v565_v20 = vshll.u32 %v1074_v19, %v550_v3  ;;  %vm568_vm5 = vcmp.lt.s32.totalorder %v549_v2, 1  ;;  %vm569_vm6 = vcmp.lt.s32.totalorder %v549_v2, 2 }
 0x12a   :  { %v554_v21 = vshrl.u32 %v1071_v12, %v551_v9  ;;  %v557_v22 = vshrl.u32 %v1072_v15, %v551_v9  ;;  %v560_v23 = vshrl.u32 %v1073_v17, %v551_v9  ;;  %v552_v24 = vshrl.u32 %v1070_v10, %v551_v9 }
 0x12b   :  { %v563_v25 = vshrl.u32 %v1074_v19, %v551_v9  ;;  %v566_v27 = vshrl.u32 %v1075_v26, %v551_v9  ;;  %vm570_vm7 = vcmp.lt.s32.totalorder %v549_v2, 3  ;;  %v759_v31 = vsub.s32 32, %v758_v6 }
 0x12c   :  { %v555_v28 = vor.u32 %v554_v21, %v553_v11  ;;  %v558_v29 = vor.u32 %v557_v22, %v556_v13  ;;  %v561_v30 = vor.u32 %v560_v23, %v559_v16  ;;  %vm571_vm8 = vcmp.lt.s32.totalorder %v549_v2, 4 }
 0x12d   :  { %v564_v32 = vor.u32 %v563_v25, %v562_v18  ;;  %v567_v33 = vor.u32 %v566_v27, %v565_v20  ;;  %v761_v34 = vshll.u32 %v1070_v10, %v758_v6  ;;  %v764_v47 = vshll.u32 %v1071_v12, %v758_v6 }
 0x12e   :  { %v572_v35 = vsel %vm568_vm5, %v552_v24, %v555_v28  ;;  %v573_v36 = vsel %vm571_vm8, %v561_v30, 2102212464  ;;  %v576_v37 = vsel %vm568_vm5, %v555_v28, %v558_v29  ;;  %v580_v38 = vsel %vm568_vm5, %v558_v29, %v561_v30 }
 0x12f   :  { %v574_v39 = vsel %vm570_vm7, %v558_v29, %v573_v36  ;;  %v577_v40 = vsel %vm571_vm8, %v564_v32, 920167782  ;;  %v581_v45 = vsel %vm571_vm8, %v567_v33, 1326507024  ;;  %v760_v50 = vshrl.u32 %v1070_v10, %v759_v31 }
 0x130   :  { %v578_v48 = vsel %vm570_vm7, %v561_v30, %v577_v40  ;;  %v582_v49 = vsel %vm570_vm7, %v564_v32, %v581_v45  ;;  %v762_v51 = vshrl.u32 %v1071_v12, %v759_v31  ;;  %v575_v52 = vsel %vm569_vm6, %v572_v35, %v574_v39 }
 0x131   :  { %v579_v54 = vsel %vm569_vm6, %v576_v37, %v578_v48  ;;  %v583_v55 = vsel %vm569_vm6, %v580_v38, %v582_v49  ;;  %v765_v56 = vshrl.u32 %v1072_v15, %v759_v31  ;;  %v767_v0 = vshll.u32 %v1072_v15, %v758_v6 }
 0x132   :  { %v1203_v57 = vmul.u32.u64.low %v1168_v1, %v583_v55  ;;  %v1204_v58 = vmul.u32.u64.high %v1168_v1, %v583_v55, %v1203_v57  ;;  %v1207_v59 = vmul.u32.u64.low %v1168_v1, %v579_v54  ;;  %v1208_v60 = vmul.u32.u64.high %v1168_v1, %v579_v54, %v1207_v59 }
 0x133   :  { %v763_v61 = vor.u32 %v762_v51, %v761_v34  ;;  %v766_v63 = vor.u32 %v765_v56, %v764_v47  ;;  %v768_v3 = vshrl.u32 %v1073_v17, %v759_v31  ;;  %v591_v2 = vmul.u32 %v1168_v1, %v575_v52 }
 0x134   :  { %v770_v4 = vshll.u32 %v1073_v17, %v758_v6  ;;  %v771_v9 = vshrl.u32 %v1074_v19, %v759_v31  ;;  %v774_v11 = vshrl.u32 %v1075_v26, %v759_v31  ;;  %v773_v16 = vshll.u32 %v1074_v19, %v758_v6 }
 0x135   :  { %v769_v13 = vor.u32 %v768_v3, %v767_v0  ;;  %vm776_vm9 = vcmp.lt.s32.totalorder %v1170_v5, 1  ;;  %vm777_vm10 = vcmp.lt.s32.totalorder %v1170_v5, 2  ;;  %vm593_vm11 = vc.u32 %v1204_v58, %v1207_v59 }
 0x136   :  { %v594_v18 = vadd.s32 1, %v1208_v60  ;;  %v772_v20 = vor.u32 %v771_v9, %v770_v4  ;;  %vm778_vm12 = vcmp.lt.s32.totalorder %v1170_v5, 3  ;;  %v775_v1 = vor.u32 %v774_v11, %v773_v16 }
 0x137   :  { %vm779_vm13 = vcmp.lt.s32.totalorder %v1170_v5, 4  ;;  %v780_v21 = vsel %vm776_vm9, %v760_v50, %v763_v61  ;;  %v784_v22 = vsel %vm776_vm9, %v763_v61, %v766_v63  ;;  %v788_v25 = vsel %vm776_vm9, %v766_v63, %v769_v13 }
 0x138   :  { %v595_v23 = vsel %vm593_vm11, %v594_v18, %v1208_v60  ;;  %v781_v6 = vsel %vm779_vm13, %v769_v13, 2102212464  ;;  %v785_v24 = vsel %vm779_vm13, %v772_v20, 920167782  ;;  %v789_v30 = vsel %vm779_vm13, %v775_v1, 1326507024 }
 0x139   :  { %v596_v27 = vadd.s32 %v595_v23, %v591_v2  ;;  %v782_v28 = vsel %vm778_vm12, %v766_v63, %v781_v6  ;;  %v786_v29 = vsel %vm778_vm12, %v769_v13, %v785_v24  ;;  %v790_v33 = vsel %vm778_vm12, %v772_v20, %v789_v30 }
 0x13a   :  { %v783_v31 = vsel %vm777_vm10, %v780_v21, %v782_v28  ;;  %v787_v32 = vsel %vm777_vm10, %v784_v22, %v786_v29  ;;  %v1231_v34 = vshrl.u32 %v1177_v14, 5  ;;  %v791_v36 = vsel %vm777_vm10, %v788_v25, %v790_v33 }
 0x13b   :  { %v597_v35 = vadd.s32 536870912, %v596_v27  ;;  %v1236_v37 = vmul.u32.u64.low %v1172_v7, %v787_v32  ;;  %v1237_v38 = vmul.u32.u64.high %v1172_v7, %v787_v32, %v1236_v37  ;;  %v654_v45 = vand.u32 31, %v1177_v14 }
 0x13c   :  { %v1241_v39 = vmul.u32.u64.low %v1172_v7, %v791_v36  ;;  %v1242_v40 = vmul.u32.u64.high %v1172_v7, %v791_v36, %v1241_v39  ;;  %v1249_v48 = vshll.u32 %v648_v8, 8  ;;  %v799_v5 = vmul.u32 %v1172_v7, %v783_v31 }
 0x13d   :  { %v1245_v47 = vshrl.u32 %v597_v35, 30  ;;  %v655_v49 = vsub.s32 32, %v654_v45  ;;  %v657_v50 = vshll.u32 %v1070_v10, %v654_v45  ;;  %vm672_vm14 = vcmp.lt.s32.totalorder %v1231_v34, 1 }
 0x13e   :  { %v802_v52 = vadd.s32 1, %v1237_v38  ;;  %v660_v54 = vshll.u32 %v1071_v12, %v654_v45  ;;  %v663_v14 = vshll.u32 %v1072_v15, %v654_v45  ;;  %vm801_vm15 = vc.u32 %v1242_v40, %v1236_v37 }
 0x13f   :  { %v599_v51 = vshll.u32 %v1245_v47, 30  ;;  %v658_v62 = vshrl.u32 %v1071_v12, %v655_v49  ;;  %v666_v7 = vshll.u32 %v1073_v17, %v654_v45  ;;  %v669_v8 = vshll.u32 %v1074_v19, %v654_v45 }
 0x140   :  { %v803_v56 = vsel %vm801_vm15, %v802_v52, %v1237_v38  ;;  %v661_v57 = vshrl.u32 %v1072_v15, %v655_v49  ;;  %v664_v60 = vshrl.u32 %v1073_v17, %v655_v49  ;;  %v667_v0 = vshrl.u32 %v1074_v19, %v655_v49 }
 0x141   :  { %v600_v55 = vsub.s32 %v596_v27, %v599_v51  ;;  %v804_v61 = vadd.s32 %v803_v56, %v799_v5  ;;  %v659_v63 = vor.u32 %v658_v62, %v657_v50  ;;  %v670_v3 = vshrl.u32 %v1075_v26, %v655_v49 }
 0x142   :  { %v662_v4 = vor.u32 %v661_v57, %v660_v54  ;;  %v665_v12 = vor.u32 %v664_v60, %v663_v14  ;;  %vm674_vm0 = vcmp.lt.s32.totalorder %v1231_v34, 3  ;;  %v668_v11 = vor.u32 %v667_v0, %v666_v7 }
 0x143   :  { %v602_v2 = vsub.s32 0, %v600_v55  ;;  %v805_v9 = vadd.s32 536870912, %v804_v61  ;;  %v671_v13 = vor.u32 %v670_v3, %v669_v8  ;;  %vm675_vm1 = vcmp.lt.s32.totalorder %v1231_v34, 4 }
 0x144   :  { %v677_v15 = vsel %vm675_vm1, %v665_v12, 2102212464  ;;  %v680_v17 = vsel %vm672_vm14, %v659_v63, %v662_v4  ;;  %v684_v19 = vsel %vm672_vm14, %v662_v4, %v665_v12  ;;  %v656_v26 = vshrl.u32 %v1070_v10, %v655_v49 }
 0x145   :  { %v874_v16 = vmin.u32 %v602_v2, %v600_v55  ;;  %v1274_v18 = vshrl.u32 %v805_v9, 30  ;;  %v681_v20 = vsel %vm675_vm1, %v668_v11, 920167782  ;;  %v685_v1 = vsel %vm675_vm1, %v671_v13, 1326507024 }
 0x146   :  { %vm673_vm2 = vcmp.lt.s32.totalorder %v1231_v34, 2  ;;  %v682_v22 = vsel %vm674_vm0, %v665_v12, %v681_v20  ;;  %v686_v23 = vsel %vm674_vm0, %v668_v11, %v685_v1  ;;  %v676_v24 = vsel %vm672_vm14, %v656_v26, %v659_v63 }
 0x147   :  { %v604_v21 = vclz %v874_v16  ;;  %v807_v6 = vshll.u32 %v1274_v18, 30  ;;  %v683_v25 = vsel %vm673_vm2, %v680_v17, %v682_v22  ;;  %v687_v10 = vsel %vm673_vm2, %v684_v19, %v686_v23 }
 0x148   :  { %v678_v28 = vsel %vm674_vm0, %v662_v4, %v677_v15  ;;  %v1292_v29 = vmul.u32.u64.low %v1249_v48, %v687_v10  ;;  %v1293_v30 = vmul.u32.u64.high %v1249_v48, %v687_v10, %v1292_v29  ;;  %v592_v39 = vadd.s32 %v1207_v59, %v1204_v58 }
 0x149   :  { %v875_v27 = vadd.s32 4294967294, %v604_v21  ;;  %v808_v31 = vsub.s32 %v804_v61, %v807_v6  ;;  %v1296_v32 = vmul.u32.u64.low %v1249_v48, %v683_v25  ;;  %v1297_v33 = vmul.u32.u64.high %v1249_v48, %v683_v25, %v1296_v32 }
 0x14a   :  { %v679_v38 = vsel %vm673_vm2, %v676_v24, %v678_v28  ;;  %v622_v12 = vsub.s32 4, %v1245_v47  ;;  %vm538_vm6 = vcmp.lt.s32.totalorder %v1148_v41, 0  ;;  %vm1318_vm7 = vcmp.le.f32.partialorder %v536_v44, 0.7853982 }
 0x14b   :  { %vm876_vm3 = vcmp.lt.s32.totalorder %v875_v27, 0  ;;  %v810_v36 = vsub.s32 0, %v808_v31  ;;  %vm697_vm4 = vc.u32 %v1293_v30, %v1296_v32  ;;  %v698_v50 = vadd.s32 1, %v1297_v33 }
 0x14c   :  { %v607_v35 = vsel %vm876_vm3, 0, %v875_v27  ;;  %v695_v14 = vmul.u32 %v1249_v48, %v679_v38  ;;  %v623_v20 = vsel %vm538_vm6, %v622_v12, %v1245_v47  ;;  %v830_v25 = vsub.s32 4, %v1274_v18 }
 0x14d   :  { %v608_v45 = vsub.s32 32, %v607_v35  ;;  %v612_v5 = vsub.s32 4294967266, %v607_v35  ;;  %v882_v49 = vmin.u32 %v810_v36, %v808_v31  ;;  %v609_v51 = vshll.u32 %v600_v55, %v607_v35 }
 0x14e   :  { %v699_v34 = vsel %vm697_vm4, %v698_v50, %v1297_v33  ;;  %v800_v55 = vadd.s32 %v1236_v37, %v1242_v40  ;;  %v625_v44 = vsel %vm1318_vm7, 0, %v623_v20  ;;  %vm746_vm8 = vcmp.lt.s32.totalorder %v1150_v42, 0 }
 0x14f   :  { %v610_v52 = vshrl.u32 %v592_v39, %v608_v45  ;;  %v613_v54 = vadd.s32 127, %v612_v5  ;;  %v812_v62 = vclz %v882_v49  ;;  %v700_v56 = vadd.s32 %v699_v34, %v695_v14 }
 0x150   :  { %v629_v28 = vadd.s32 3, %v625_v44  ;;  %v831_v29 = vsel %vm746_vm8, %v830_v25, %v1274_v18  ;;  %vm1333_vm10 = vcmp.le.f32.partialorder %v744_v46, 0.7853982  ;;  %v696_v35 = vadd.s32 %v1296_v32, %v1293_v30 }
 0x151   :  { %v611_v7 = vor.u32 %v610_v52, %v609_v51  ;;  %v614_v8 = vshll.u32 %v613_v54, 23  ;;  %v883_v58 = vadd.s32 4294967294, %v812_v62  ;;  %v701_v57 = vadd.s32 536870912, %v700_v56 }
 0x152   :  { %v630_v5 = vand.u32 3, %v629_v28  ;;  %v833_v18 = vsel %vm1333_vm10, 0, %v831_v29  ;;  %vm628_vm14 = vweird.f32 %v1148_v41  ;;  %vm1348_vm15 = vcmp.le.f32.partialorder %v640_v53, 0.7853982 }
 0x153   :  { %v615_v59 = vor.u32 4788187, %v614_v8  ;;  %vm884_vm5 = vcmp.lt.s32.totalorder %v883_v58, 0  ;;  %v618_v61 = vcvt.s32.f32 %v611_v7  ;;  %v1309_v0 = vshrl.u32 %v701_v57, 30 }
 0x154   :  { %v815_v63 = vsel %vm884_vm5, 0, %v883_v58  ;;  %vm635_vm11 = vcmp.eq.s32.totalorder %v630_v5, 2  ;;  %vm632_vm12 = vcmp.eq.s32.totalorder %v630_v5, 0  ;;  %v837_v34 = vadd.s32 3, %v833_v18 }
 0x155   :  { %v616_v60 = vand.u32 2147483647, %v615_v59  ;;  %v816_v3 = vsub.s32 32, %v815_v63  ;;  %v820_v48 = vsub.s32 4294967266, %v815_v63  ;;  %v703_v4 = vshll.u32 %v1309_v0, 30 }
 0x156   :  { %v817_v9 = vshll.u32 %v808_v31, %v815_v63  ;;  %vm631_vm13 = vcmp.lt.s32.totalorder %v630_v5, 2  ;;  %v726_v63 = vsub.s32 4, %v1309_v0  ;;  %vm642_vm0 = vcmp.lt.s32.totalorder %v1152_v43, 0 }
 0x157   :  { %v619_v2 = vmul.f32 %v618_v61, %v616_v60  ;;  %v818_v11 = vshrl.u32 %v800_v55, %v816_v3  ;;  %v821_v13 = vadd.s32 127, %v820_v48  ;;  %v704_v15 = vsub.s32 %v700_v56, %v703_v4 }
 0x158   :  { %v838_v60 = vand.u32 3, %v837_v34  ;;  %vm836_vm4 = vweird.f32 %v1150_v42 }
 0x159   :  { %v620_v16 = vxor.u32 2147483648, %v619_v2  ;;  %v819_v17 = vor.u32 %v818_v11, %v817_v9  ;;  %v822_v19 = vshll.u32 %v821_v13, 23  ;;  %v706_v26 = vsub.s32 0, %v704_v15 }
 0x15a   :  { %vm843_vm1 = vcmp.eq.s32.totalorder %v838_v60, 2  ;;  %v727_v9 = vsel %vm642_vm0, %v726_v63, %v1309_v0  ;;  %vm840_vm2 = vcmp.eq.s32.totalorder %v838_v60, 0  ;;  %vm839_vm3 = vcmp.lt.s32.totalorder %v838_v60, 2 }
 0x15b   :  { %v621_v40 = vsel %vm538_vm6, %v620_v16, %v619_v2  ;;  %v823_v21 = vor.u32 4788187, %v822_v19  ;;  %v878_v22 = vmin.u32 %v706_v26, %v704_v15  ;;  %v826_v6 = vcvt.s32.f32 %v819_v17 }
 0x15c   :  { %v624_v1 = vsel %vm1318_vm7, %v1148_v41, %v621_v40 }
 0x15d   :  { %979 = vcosq.f32 %v624_v1  ;;  %v824_v23 = vand.u32 2147483647, %v823_v21  ;;  %v708_v24 = vclz %v878_v22 }
 0x15e   :  { %981 = vsinq.f32 %v624_v1 }
 0x15f   :  { %v827_v10 = vmul.f32 %v826_v6, %v824_v23  ;;  %v879_v27 = vadd.s32 4294967294, %v708_v24 }
 0x161   :  { %v828_v47 = vxor.u32 2147483648, %v827_v10  ;;  %vm880_vm9 = vcmp.lt.s32.totalorder %v879_v27, 0 }
 0x162   :  { %v711_v36 = vsel %vm880_vm9, 0, %v879_v27 }
 0x163   :  { %v829_v33 = vsel %vm746_vm8, %v828_v47, %v827_v10  ;;  %v712_v39 = vsub.s32 32, %v711_v36  ;;  %v716_v45 = vsub.s32 4294967266, %v711_v36  ;;  %v713_v49 = vshll.u32 %v704_v15, %v711_v36 }
 0x164   :  { %v832_v38 = vsel %vm1333_vm10, %v1150_v42, %v829_v33  ;;  %v729_v15 = vsel %vm1348_vm15, 0, %v727_v9  ;;  %vm732_vm8 = vweird.f32 %v1152_v43 }
 0x165   :  { %983 = vcosq.f32 %v832_v38  ;;  %v714_v50 = vshrl.u32 %v696_v35, %v712_v39  ;;  %v717_v51 = vadd.s32 127, %v716_v45  ;;  %v733_v19 = vadd.s32 3, %v729_v15 }
 0x166   :  { %985 = vsinq.f32 %v832_v38 }
 0x167   :  { %v980_v46 = vpop.eup %979  ;;  %v715_v30 = vor.u32 %v714_v50, %v713_v49  ;;  %v718_v32 = vshll.u32 %v717_v51, 23  ;;  %v734_v0 = vand.u32 3, %v733_v19 }
 0x168   :  { %v982_v52 = vpop.eup %981  ;;  %v636_v54 = vxor.u32 2147483648, %v980_v46 }
 0x169   :  { %v633_v14 = vxor.u32 2147483648, %v982_v52  ;;  %v719_v7 = vor.u32 4788187, %v718_v32  ;;  %v722_v59 = vcvt.s32.f32 %v715_v30  ;;  %vm739_vm5 = vcmp.eq.s32.totalorder %v734_v0, 2 }
 0x16a   :  { %v637_v62 = vsel %vm635_vm11, %v636_v54, %v982_v52  ;;  %vm736_vm6 = vcmp.eq.s32.totalorder %v734_v0, 0  ;;  %vm735_vm7 = vcmp.lt.s32.totalorder %v734_v0, 2 }
 0x16b   :  { %v634_v8 = vsel %vm632_vm12, %v980_v46, %v633_v14  ;;  %v720_v58 = vand.u32 2147483647, %v719_v7 }
 0x16c   :  { %v638_v56 = vsel %vm631_vm13, %v634_v8, %v637_v62 }
 0x16d   :  { %v639_v57 = vsel %vm628_vm14, nan, %v638_v56  ;;  %v723_v61 = vmul.f32 %v722_v59, %v720_v58 }
 0x16e   :  { %848 = vst [vmem:[#allocation7] sm:$0xff] %v639_v57 }
 0x16f   :  { %v984_v55 = vpop.eup %983  ;;  %v724_v48 = vxor.u32 2147483648, %v723_v61 }
 0x170   :  { %v986_v3 = vpop.eup %985  ;;  %v844_v2 = vxor.u32 2147483648, %v984_v55 }
 0x171   :  { %v841_v41 = vxor.u32 2147483648, %v986_v3  ;;  %v725_v12 = vsel %vm642_vm0, %v724_v48, %v723_v61 }
 0x172   :  { %v845_v11 = vsel %vm843_vm1, %v844_v2, %v986_v3  ;;  %v728_v13 = vsel %vm1348_vm15, %v1152_v43, %v725_v12 }
 0x173   :  { %v842_v16 = vsel %vm840_vm2, %v984_v55, %v841_v41  ;;  %987 = vcosq.f32 %v728_v13 }
 0x174   :  { %v846_v53 = vsel %vm839_vm3, %v842_v16, %v845_v11  ;;  %989 = vsinq.f32 %v728_v13 }
 0x175   :  { %v847_v17 = vsel %vm836_vm4, nan, %v846_v53 }
 0x176   :  { %850 = vst [vmem:[#allocation7 + $0x10] sm:$0xff] %v847_v17 }
 0x17d   :  { %v988_v37 = vpop.eup %987 }
 0x17e   :  { %v990_v40 = vpop.eup %989  ;;  %v740_v26 = vxor.u32 2147483648, %v988_v37 }
 0x17f   :  { %v737_v20 = vxor.u32 2147483648, %v990_v40 }
 0x180   :  { %v741_v1 = vsel %vm739_vm5, %v740_v26, %v990_v40 }
 0x181   :  { %v738_v42 = vsel %vm736_vm6, %v988_v37, %v737_v20 }
 0x182   :  { %v742_v21 = vsel %vm735_vm7, %v738_v42, %v741_v1 }
 0x183   :  { %v743_v22 = vsel %vm732_vm8, nan, %v742_v21 }
 0x184   :  { %849 = vst [vmem:[#allocation7 + $0x8] sm:$0xff] %v743_v22 }
 0x185   :  { %1046 = shalt.err (!%p1043_p6)
}
 0x186   :  { %s1047_s20 = scalar_lea.hbm %s1377_s4, 384 }
 0x187   :  { %p1048_p7 = scmp.ne.s32.totalorder %s1377_s4, %s1047_s20  ;;  %p1051_p8 = scmp.lt.u32.totalorder %s1047_s20, %s1377_s4 }
 0x189   :  { %p1053_p9 = pnand %p1051_p8, %p1048_p7 }
 0x18b   :  { %1056 = shalt.err (!%p1053_p9)
}
 0x18c   :  { %860 = dma.vmem_to_hbm [thread:$0]  %s858_s3, 384, %s1377_s4, [#allocation4]  }
 0x18d   :  { %1061 = dma.done.wait [#allocation4], 384  }
 0x18e   :  { %1062 = vsyncadd [#allocation4], 4294966912 }
 0x18f   :  { %864 = vsyncpa [#allocation3], 1 }
 0x190   :  { %865 = vsyncpa [#allocation6], 1 }
 0x191   :  { %866 = vsyncpa [#allocation4], 1 }

</bundles_post_ra>
